<compile_context>
chip_gen: v7x
topology: tpu7x:2x2x1
jax: 0.10.0
libtpu: 0.0.40
codegen_flags: <defaults>
</compile_context>

<pallas_src>
import jax
import jax.numpy as jnp
from jax import lax
from jax.experimental import pallas as pl
from jax.experimental.pallas import tpu as pltpu

EPS = 1e-09
TEMP = 0.66  # digit_temp constant (unused in forward compute)


def encoder_b_kernel(x_ref, w1_ref, b1_ref, w2_ref, b2_ref, out_ref):
    # First linear + ReLU (MXU matmul, f32 accumulation).
    h = jnp.dot(x_ref[...], w1_ref[...], preferred_element_type=jnp.float32)
    h = jnp.maximum(h + b1_ref[...], 0.0)                    # (TM, H)

    # Second linear.
    stat = jnp.dot(h, w2_ref[...], preferred_element_type=jnp.float32)
    stat = stat + b2_ref[...]                                # (TM, 2Z)

    # Fused output: first Z lanes hold mu (= stat), last Z lanes hold std.
    # Lane-mask select avoids in-kernel lane slicing / concatenation.
    two_z = out_ref.shape[-1]
    z = two_z // 2
    col = lax.broadcasted_iota(jnp.int32, stat.shape, dimension=1)
    std_all = jnp.sqrt(jnp.exp(stat) + EPS)
    out_ref[...] = jnp.where(col < z, stat, std_all)


def encoder_b_forward(labels, params, num_samples=None, tile_rows=1024):
    """labels: (B, num_digis) or (S, B, num_digis).

    Returns (mu, std), each of shape (S, B, zShared_dim).
    """
    w1, b1, w2, b2 = params
    w1 = w1.astype(jnp.float32)
    b1 = b1.astype(jnp.float32).reshape(1, -1)
    w2 = w2.astype(jnp.float32)
    b2 = b2.astype(jnp.float32).reshape(1, -1)

    if labels.ndim == 2:
        # @expand_inputs would tile identical labels S times — compute once,
        # broadcast the outputs instead (S-fold less HBM traffic and compute).
        dedup = True
        S = 1 if num_samples is None else int(num_samples)
        x2d = labels.astype(jnp.float32)
        B, D = x2d.shape
    else:
        dedup = False
        S, B, D = labels.shape
        x2d = labels.reshape(S * B, D).astype(jnp.float32)

    H = w1.shape[1]
    Z2 = w2.shape[1]
    Z = Z2 // 2
    N = x2d.shape[0]

    # Row tile: single tile for small N (avoid per-grid-step overhead),
    # otherwise tile_rows (fits comfortably in v7x's 64 MiB VMEM: ~1.3 MiB
    # of live f32 per 1024-row tile including double buffering).
    if N <= tile_rows:
        TM = max(8, pl.cdiv(N, 8) * 8)       # sublane-aligned single tile
    else:
        TM = tile_rows
    N_pad = pl.cdiv(N, TM) * TM
    if N_pad != N:
        x2d = jnp.pad(x2d, ((0, N_pad - N), (0, 0)))

    grid = (N_pad // TM,)

    out = pl.pallas_call(
        encoder_b_kernel,
        out_shape=jax.ShapeDtypeStruct((N_pad, 2 * Z), jnp.float32),
        grid=grid,
        in_specs=[
            pl.BlockSpec((TM, D), lambda i: (i, 0)),          # x rows (tiled)
            pl.BlockSpec((D, H), lambda i: (0, 0)),           # W1 (resident)
            pl.BlockSpec((1, H), lambda i: (0, 0)),           # b1
            pl.BlockSpec((H, 2 * Z), lambda i: (0, 0)),       # W2
            pl.BlockSpec((1, 2 * Z), lambda i: (0, 0)),       # b2
        ],
        out_specs=pl.BlockSpec((TM, 2 * Z), lambda i: (i, 0)),
        compiler_params=pltpu.CompilerParams(
            dimension_semantics=("parallel",)),
    )(x2d, w1, b1, w2, b2)

    out = out[:N]
    mu = out[:, :Z]
    std = out[:, Z:]

    if dedup:
        mu = jnp.broadcast_to(mu[None, :, :], (S, B, Z))
        std = jnp.broadcast_to(std[None, :, :], (S, B, Z))
    else:
        mu = mu.reshape(S, B, Z)
        std = std.reshape(S, B, Z)
    return mu, std


def init_encoder_b_params(key, num_digis=10, num_hidden=256, zShared_dim=10):
    """Deterministic Kaiming-normal init (weights), zero bias — mirrors kaiming_init."""
    k1, k2 = jax.random.split(key)
    # Kaiming normal: std = sqrt(2 / fan_in); weights stored as (in, out).
    w1 = jax.random.normal(k1, (num_digis, num_hidden), jnp.float32) * jnp.sqrt(
        2.0 / num_digis
    )
    b1 = jnp.zeros((1, num_hidden), jnp.float32)
    w2 = jax.random.normal(k2, (num_hidden, 2 * zShared_dim), jnp.float32) * jnp.sqrt(
        2.0 / num_hidden
    )
    b2 = jnp.zeros((1, 2 * zShared_dim), jnp.float32)
    return (w1, b1, w2, b2)


def _reference_forward(labels2d, params, num_samples, zShared_dim):
    """Pure-JAX reference mirroring the PyTorch module."""
    w1, b1, w2, b2 = params
    h = jnp.maximum(labels2d @ w1 + b1, 0.0)
    stat = h @ w2 + b2
    mu = stat[:, :zShared_dim]
    std = jnp.sqrt(jnp.exp(stat[:, zShared_dim:]) + EPS)
    mu = jnp.broadcast_to(mu[None], (num_samples,) + mu.shape)
    std = jnp.broadcast_to(std[None], (num_samples,) + std.shape)
    return mu, std


if __name__ == "__main__":
    key = jax.random.PRNGKey(0)
    kp, kx = jax.random.split(key)

    num_digis = 10
    num_hidden = 64      # small hidden (module default 256)
    zShared_dim = 10
    batch = 8
    num_samples = 2

    params = init_encoder_b_params(
        kp, num_digis=num_digis, num_hidden=num_hidden, zShared_dim=zShared_dim
    )

    # one-hot labels, batch of digits
    digit_ids = jax.random.randint(kx, (batch,), 0, num_digis)
    labels = jax.nn.one_hot(digit_ids, num_digis, dtype=jnp.float32)

    mu, std = encoder_b_forward(labels, params, num_samples=num_samples)
    jax.block_until_ready((mu, std))

    assert mu.shape == (num_samples, batch, zShared_dim)
    assert std.shape == (num_samples, batch, zShared_dim)
    assert bool(jnp.all(std > 0.0))

    # Correctness vs. pure-JAX reference.
    mu_ref, std_ref = _reference_forward(labels, params, num_samples, zShared_dim)
    assert bool(jnp.allclose(mu, mu_ref, atol=1e-5, rtol=1e-5))
    assert bool(jnp.allclose(std, std_ref, atol=1e-5, rtol=1e-5))

    print("KERNEL_OK")
</pallas_src>

<mosaic_0001>
module attributes {stable_mosaic.version = 11 : i64} {
  func.func @encoder_b_kernel(%arg0: i32, %arg1: memref<8x10xf32, #tpu.memory_space<vmem>>, %arg2: memref<10x64xf32, #tpu.memory_space<vmem>>, %arg3: memref<1x64xf32, #tpu.memory_space<vmem>>, %arg4: memref<64x20xf32, #tpu.memory_space<vmem>>, %arg5: memref<1x20xf32, #tpu.memory_space<vmem>>, %arg6: memref<8x20xf32, #tpu.memory_space<vmem>>) attributes {dimension_semantics = [#tpu.dimension_semantics<parallel>], iteration_bounds = array<i64: 1>, scalar_prefetch = 0 : i64, scratch_operands = 0 : i64, tpu.core_type = #tpu.core_type<tc>, window_params = [{transform_indices = @transform_0, window_bounds = array<i64: 8, 10>}, {pipeline_mode = #tpu.pipeline_mode<synchronous>, transform_indices = @transform_1, window_bounds = array<i64: 10, 64>}, {pipeline_mode = #tpu.pipeline_mode<synchronous>, transform_indices = @transform_2, window_bounds = array<i64: 1, 64>}, {pipeline_mode = #tpu.pipeline_mode<synchronous>, transform_indices = @transform_3, window_bounds = array<i64: 64, 20>}, {pipeline_mode = #tpu.pipeline_mode<synchronous>, transform_indices = @transform_4, window_bounds = array<i64: 1, 20>}, {transform_indices = @transform_5, window_bounds = array<i64: 8, 20>}]} {
    %c0 = arith.constant 0 : index
    %c0_0 = arith.constant 0 : index
    %0 = vector.load %arg1[%c0, %c0_0] : memref<8x10xf32, #tpu.memory_space<vmem>>, vector<8x10xf32>
    %c0_1 = arith.constant 0 : index
    %c0_2 = arith.constant 0 : index
    %1 = vector.load %arg2[%c0_1, %c0_2] : memref<10x64xf32, #tpu.memory_space<vmem>>, vector<10x64xf32>
    %cst = arith.constant dense<0.000000e+00> : vector<8x64xf32>
    %2 = tpu.matmul %0, %1, %cst {dimension_numbers = #tpu.dot_dimension_numbers<[1], [0], [0], [1], [0, 0, 1, 1], [], []>} : vector<8x10xf32>, vector<10x64xf32>, vector<8x64xf32> -> vector<8x64xf32>
    %c0_3 = arith.constant 0 : index
    %c0_4 = arith.constant 0 : index
    %3 = vector.load %arg3[%c0_3, %c0_4] : memref<1x64xf32, #tpu.memory_space<vmem>>, vector<1x64xf32>
    %4 = vector.broadcast %3 : vector<1x64xf32> to vector<8x64xf32>
    %5 = arith.addf %2, %4 : vector<8x64xf32>
    %cst_5 = arith.constant 0.000000e+00 : f32
    %6 = vector.broadcast %cst_5 : f32 to vector<8x64xf32>
    %7 = arith.maximumf %5, %6 : vector<8x64xf32>
    %c0_6 = arith.constant 0 : index
    %c0_7 = arith.constant 0 : index
    %8 = vector.load %arg4[%c0_6, %c0_7] : memref<64x20xf32, #tpu.memory_space<vmem>>, vector<64x20xf32>
    %cst_8 = arith.constant dense<0.000000e+00> : vector<8x20xf32>
    %9 = tpu.matmul %7, %8, %cst_8 {dimension_numbers = #tpu.dot_dimension_numbers<[1], [0], [0], [1], [0, 0, 1, 1], [], []>} : vector<8x64xf32>, vector<64x20xf32>, vector<8x20xf32> -> vector<8x20xf32>
    %c0_9 = arith.constant 0 : index
    %c0_10 = arith.constant 0 : index
    %10 = vector.load %arg5[%c0_9, %c0_10] : memref<1x20xf32, #tpu.memory_space<vmem>>, vector<1x20xf32>
    %11 = vector.broadcast %10 : vector<1x20xf32> to vector<8x20xf32>
    %12 = arith.addf %9, %11 : vector<8x20xf32>
    %13 = tpu.iota {dimensions = array<i32: 1>} : vector<8x20xi32>
    %14 = math.exp %12 : vector<8x20xf32>
    %cst_11 = arith.constant 9.99999971E-10 : f32
    %15 = vector.broadcast %cst_11 : f32 to vector<8x20xf32>
    %16 = arith.addf %14, %15 : vector<8x20xf32>
    %17 = math.sqrt %16 : vector<8x20xf32>
    %c10_i32 = arith.constant 10 : i32
    %18 = vector.broadcast %c10_i32 : i32 to vector<8x20xi32>
    %19 = arith.cmpi slt, %13, %18 : vector<8x20xi32>
    %20 = arith.select %19, %12, %17 : vector<8x20xi1>, vector<8x20xf32>
    %c0_12 = arith.constant 0 : index
    %c0_13 = arith.constant 0 : index
    %21 = vector.load %arg6[%c0_12, %c0_13] : memref<8x20xf32, #tpu.memory_space<vmem>>, vector<8x20xf32>
    tpu.vector_store %arg6[%c0_12, %c0_13], %20 {strides = array<i32>} : memref<8x20xf32, #tpu.memory_space<vmem>>, vector<8x20xf32>,
    return
  }
  func.func @transform_0(%arg0: i32) -> (i32, i32) {
    %c0_i32 = arith.constant 0 : i32
    %c0_i32_0 = arith.constant 0 : i32
    return %arg0, %c0_i32 : i32, i32
  }
  func.func @transform_1(%arg0: i32) -> (i32, i32) {
    %c0_i32 = arith.constant 0 : i32
    %c0_i32_0 = arith.constant 0 : i32
    %c0_i32_1 = arith.constant 0 : i32
    return %c0_i32, %c0_i32_0 : i32, i32
  }
  func.func @transform_2(%arg0: i32) -> (i32, i32) {
    %c0_i32 = arith.constant 0 : i32
    %c0_i32_0 = arith.constant 0 : i32
    %c0_i32_1 = arith.constant 0 : i32
    return %c0_i32, %c0_i32_0 : i32, i32
  }
  func.func @transform_3(%arg0: i32) -> (i32, i32) {
    %c0_i32 = arith.constant 0 : i32
    %c0_i32_0 = arith.constant 0 : i32
    %c0_i32_1 = arith.constant 0 : i32
    return %c0_i32, %c0_i32_0 : i32, i32
  }
  func.func @transform_4(%arg0: i32) -> (i32, i32) {
    %c0_i32 = arith.constant 0 : i32
    %c0_i32_0 = arith.constant 0 : i32
    %c0_i32_1 = arith.constant 0 : i32
    return %c0_i32, %c0_i32_0 : i32, i32
  }
  func.func @transform_5(%arg0: i32) -> (i32, i32) {
    %c0_i32 = arith.constant 0 : i32
    %c0_i32_0 = arith.constant 0 : i32
    return %arg0, %c0_i32 : i32, i32
  }
}

</mosaic_0001>

<bundles_post_ra>
// kernel: tpu_custom_call.1
= control target key start
LH: loop header
LB: loop body
LE: loop exit
PB: predicated region body
PF: predicated region fallthrough
CT: control target
= control target key end

     0   :  { %vm35_vm0 = vcmask 1041408   ;;  %v321_v2 = vmov 0.0|0.0   ;;  %vm322_vm1 = vmmov 1   ;;  %vm323_vm3 = vmmov 0   ;;  %s407_s0 = inlined_call_operand.vmem [shape: f32[8,10], index: 0, kind: input, shape index: {}]   ;;  %s408_s1 = inlined_call_operand.vmem [shape: f32[10,64], index: 1, kind: input, shape index: {}]   ;;  %s409_s2 = inlined_call_operand.vmem [shape: f32[1,64], index: 2, kind: input, shape index: {}]   ;;  %s410_s3 = inlined_call_operand.vmem [shape: f32[64,20], index: 3, kind: input, shape index: {}]   ;;  %s411_s4 = inlined_call_operand.vmem [shape: f32[1,20], index: 4, kind: input, shape index: {}]   ;;  %s412_s5 = inlined_call_operand.hbm [shape: f32[8,20], index: 5, kind: output, shape index: {}]  }
   0x1   :  { %v22_v0 = vld [vmem:[%s408_s1] sm:$0xff]  ;;  %v23_v1 = vld [vmem:[%s408_s1 + $0x8] sm:$0x3]  ;;  %272 = vmatprep.subr.bf16.mxu0 %v321_v2  ;;  %vm274_vm2 = vmpackc.low %vm35_vm0, %vm322_vm1  ;;  %276 = vmatprep.subr.bf16.mxu1 %v321_v2  ;;  %v324_v5 = vmov 0.0   ;;  %vm31_vm4 = vcmask 80896  }
   0x2   :  { %v273_v3 = vpack.c.bf16 %v23_v1, %v22_v0  ;;  %v110_v4 = vld [vmem:[%s410_s3] sm:$0xff]  ;;  %250 = vmatprep.mubr.msk.f32.mxu0 %vm323_vm3, %v324_v5  ;;  %v111_v6 = vld [vmem:[%s410_s3 + $0x8] sm:$0xff]  ;;  %v112_v7 = vld [vmem:[%s410_s3 + $0x10] sm:$0xff]  ;;  %269 = vmatprep.mubr.msk.f32.mxu1 %vm323_vm3, %v324_v5 }
   0x3   :  { %v113_v8 = vld [vmem:[%s410_s3 + $0x18] sm:$0xff]  ;;  %v21_v9 = vld [vmem:[%s407_s0] sm:$0xff]  ;;  %v277_v10 = vpack.c.bf16 %v111_v6, %v110_v4 }
   0x4   :  { %275 = vmatpush3.bf16.msk.msra.mxu0 %vm274_vm2, %v273_v3 }
   0x5   :  { %10 = vsyncpa [#allocation3], 0  ;;  %278 = vmatpush3.bf16.msra.mxu1 %v277_v10  ;;  %v280_v11 = vpack.c.bf16 %v113_v8, %v112_v7  ;;  %v114_v12 = vld [vmem:[%s410_s3 + $0x20] sm:$0xff]  ;;  %v115_v13 = vld [vmem:[%s410_s3 + $0x28] sm:$0xff]  ;;  %vm125_vm5 = vcmask 523264   ;;  %v199_v30 = vlaneseq  ;;  %vm213_vm9 = vcmask 162816  }
   0x6   :  { %279 = vmatprep.subr.bf16.mxu1 %v321_v2  ;;  %v283_v14 = vpack.c.bf16 %v115_v13, %v114_v12  ;;  %v116_v15 = vld [vmem:[%s410_s3 + $0x30] sm:$0xff]  ;;  %v117_v16 = vld [vmem:[%s410_s3 + $0x38] sm:$0xff]  ;;  %v229_v18 = vld [vmem:[%s409_s2] ss:$0 sm:$0xff]  ;;  %s325_s2 = smov [#allocation2]  }
   0x7   :  { %251 = vmatmul.mubr.msk.f32.vlgmr.msra.gmra.mrb[0].mxu0 %vm31_vm4, %v21_v9  ;;  %v286_v17 = vpack.c.bf16 %v117_v16, %v116_v15  ;;  %v232_v23 = vld [vmem:[%s411_s4] ss:$0 sm:$0xff]  ;;  %v200_v31 = vand.u32 127, %v199_v30  ;;  %s221_s3 = sshll.u32 %s325_s2, 4  ;;  %s222_s3 = int_to_ptr.vmem [resolvable:$true] %s221_s3 }
   0x8   :  { %s297_s4 = scalar_lea.vmem %s222_s3, 128  ;;  %p302_p1 = scmp.lt.s32.totalorder %s222_s3, %s222_s3 }
   0x9   :  { %281 = vmatpush3.bf16.msra.mxu1 %v280_v11  ;;  %vm211_vm7 = vcmp.lt.s32.totalorder %v200_v31, 10  ;;  %p298_p0 = scmp.ne.s32.totalorder %s222_s3, %s297_s4  ;;  %p303_p2 = scmp.lt.s32.totalorder %s297_s4, %s297_s4 }
   0xa   :  { %282 = vmatprep.subr.bf16.mxu1 %v321_v2 }
   0xb   :  { %p304_p3 = por %p303_p2, %p302_p1 }
   0xd   :  { %284 = vmatpush3.bf16.msra.mxu1 %v283_v14  ;;  %p305_p4 = pnand %p304_p3, %p298_p0 }
   0xe   :  { %285 = vmatprep.subr.bf16.mxu1 %v321_v2 }
  0x11   :  { %287 = vmatpush3.bf16.msra.mxu1 %v286_v17 }
  0xda   :  { %v105_v19 = vpop.f32.mrb[0].mxu0 }
  0xdb   :  { %v106_v20 = vadd.f32 %v229_v18, %v105_v19  ;;  %v252_v21 = vpop.f32.mrb[1].mxu0 }
  0xdd   :  { %v109_v22 = vmax.f32 %v106_v20, 0.0 }
  0xdf   :  { %270 = vmatmul.mubr.msk.f32.vlgmr.msra.gmra.mrb[0].mxu1 %vm125_vm5, %v109_v22 }
 0x1b2   :  { %v195_v24 = vpop.f32.mrb[0].mxu1 }
 0x1b3   :  { %v196_v25 = vadd.f32 %v232_v23, %v195_v24  ;;  %v271_v26 = vpop.f32.mrb[1].mxu1 }
 0x1b5   :  { %v201_v27 = vmul.f32 1.442695, %v196_v25 }
 0x1b7   :  { %293 = vpow2.f32 %v201_v27 }
 0x1c1   :  { %v294_v28 = vpop.eup %293 }
 0x1c2   :  { %v203_v29 = vadd.f32 1e-09, %v294_v28 }
 0x1c4   :  { %295 = vrsqrt.f32 %v203_v29  ;;  %vm206_vm6 = vcmp.eq.f32.partialorder %v203_v29, inf  ;;  %v209_v34 = vand.u32 2147483648, %v203_v29  ;;  %vm208_vm8 = vcmp.eq.f32.partialorder %v203_v29, 0.0 }
 0x1ce   :  { %v296_v32 = vpop.eup %295 }
 0x1cf   :  { %v205_v33 = vmul.f32 %v296_v32, %v203_v29 }
 0x1d1   :  { %v207_v35 = vsel %vm206_vm6, %v203_v29, %v205_v33 }
 0x1d2   :  { %v210_v36 = vsel %vm208_vm8, %v209_v34, %v207_v35 }
 0x1d3   :  { %v212_v37 = vsel %vm211_vm7, %v196_v25, %v210_v36 }
 0x1d4   :  { %214 = vst.msk [vmem:[#allocation2] sm:$0xff] %vm213_vm9, %v212_v37 }
 0x1d5   :  { %308 = shalt.err (!%p305_p4)
}
 0x1d6   :  { %s309_s19 = scalar_lea.hbm %s412_s5, 128 }
 0x1d7   :  { %p310_p5 = scmp.ne.s32.totalorder %s412_s5, %s309_s19  ;;  %p313_p6 = scmp.lt.u32.totalorder %s309_s19, %s412_s5 }
 0x1d9   :  { %p315_p7 = pnand %p313_p6, %p310_p5 }
 0x1db   :  { %318 = shalt.err (!%p315_p7)
}
 0x1dc   :  { %224 = dma.vmem_to_hbm [thread:$0]  %s222_s3, 128, %s412_s5, [#allocation3]  }
 0x1dd   :  { %319 = dma.done.wait [#allocation3], 128  }
 0x1de   :  { %320 = vsyncadd [#allocation3], 4294967168 }
 0x1df   :  { %228 = vsyncpa [#allocation3], 1 }

</bundles_post_ra>
